<compile_context>
chip_gen: v7x
topology: tpu7x:2x2x1
jax: 0.10.0
libtpu: 0.0.40
codegen_flags: <defaults>
</compile_context>

<pallas_src>
import functools

import numpy as np
import jax
import jax.numpy as jnp
from jax import lax
from jax.experimental import pallas as pl
from jax.experimental.pallas import tpu as pltpu


def _warp_loss_kernel(x1s_ref, x2s_ref, x1t_ref, x2t_ref, ff_ref, fb_ref,
                      sum_f_ref, sum_b_ref, *, C, H4, W4, TQ, matmul_dtype):
    """One (batch b, output-slab j) grid step.

    x1s/x2s : (1, C, H4, W4) source frames, matmul dtype (resident per b).
    x1t/x2t : (1, C, TQ)     target slab, f32 (streamed per slab).
    ff/fb   : (1, 2, TQ)     flow slab (row 0 = x-flow, row 1 = y-flow), f32.
    sum_f/b : (1, 1, TQ)     per-lane L1 partial sums (resident per b).
    """
    j = pl.program_id(1)

    @pl.when(j == 0)
    def _():
        sum_f_ref[...] = jnp.zeros_like(sum_f_ref)
        sum_b_ref[...] = jnp.zeros_like(sum_b_ref)

    # Integer source coordinates of the pooled grid (tiny column vectors).
    xs = lax.broadcasted_iota(jnp.int32, (W4, 1), 0).astype(jnp.float32)
    ys = lax.broadcasted_iota(jnp.int32, (H4, 1), 0).astype(jnp.float32)

    # Output-pixel coordinates of this slab (row-major flattened, lane axis).
    # Exact for Q_pad < 2**24 (asserted in the wrapper).
    pidx = (lax.broadcasted_iota(jnp.int32, (1, TQ), 1)
            + j * TQ).astype(jnp.float32)                        # (1, TQ)
    py = jnp.floor(pidx / W4)
    px = pidx - py * W4

    def direction(src_ref, tgt_ref, flow_ref, acc_ref):
        f = flow_ref[0]                                          # (2, TQ)
        sx = px + f[0:1, :]                                      # sample x
        sy = py + f[1:2, :]                                      # sample y
        # Separable bilinear (tent) weights.  Zeros padding is implicit:
        # out-of-range sample coords get zero weight from every source tap.
        ax = jnp.maximum(1.0 - jnp.abs(xs - sx), 0.0)            # (W4, TQ)
        ay = jnp.maximum(1.0 - jnp.abs(ys - sy), 0.0)            # (H4, TQ)
        ax_mx = ax.astype(matmul_dtype)

        tgt = tgt_ref[0]                                         # (C, TQ) f32
        part = jnp.zeros((1, TQ), jnp.float32)
        for c in range(C):                                       # C is small; unrolled
            # Stage 1 (MXU): contract the source-x axis.
            g = jnp.dot(src_ref[0, c], ax_mx,
                        preferred_element_type=jnp.float32)      # (H4, TQ)
            # Stage 2 (VPU, f32): contract the source-y axis.
            wc = jnp.sum(g * ay, axis=0, keepdims=True)          # (1, TQ)
            part = part + jnp.abs(wc - tgt[c:c + 1, :])
        acc_ref[...] += part[None]

    # Forward: warp frame t with the forward flow, compare against frame t+1.
    direction(x1s_ref, x2t_ref, ff_ref, sum_f_ref)
    # Backward: warp frame t+1 with the backward flow, compare against frame t.
    direction(x2s_ref, x1t_ref, fb_ref, sum_b_ref)


def _round_up(x, m):
    return -(-x // m) * m


def _vmem_capacity_bytes():
    try:
        return int(pltpu.get_tpu_info().vmem_capacity_bytes)
    except Exception:
        return 64 << 20          # conservative fallback (v7x per-TensorCore)


def _choose_tiling(H4, W4, C, src_itemsize):
    """Pick the output-slab lane width TQ from the per-generation VMEM budget."""
    Q = H4 * W4
    budget = int(_vmem_capacity_bytes() * 0.85)       # leave ~15% headroom
    H4p = _round_up(H4, 8)
    W4p_lane = _round_up(W4, 128)
    W4p_sub = _round_up(W4, 8)
    Cp = _round_up(C, 8)

    # Resident, TQ-independent: both source frames (double-buffered blocks).
    fixed = 2 * 2 * C * H4p * W4p_lane * src_itemsize
    # Streamed blocks per output lane: targets, flows, per-lane accumulators
    # (each double-buffered, sublane-padded to 8).
    stream_per_lane = 2 * 2 * (Cp + 8 + 8) * 4
    # In-kernel temporaries per lane (ax f32 + cast, ay, stage-1/2 products,
    # target slab, partials, coord row vectors) with a safety factor.
    temp_per_lane = int((6 * W4p_sub + 12 * H4p + 64) * 1.5)
    per_lane = stream_per_lane + temp_per_lane
    headroom = 4 << 20

    avail = budget - fixed - headroom
    q_lanes = _round_up(Q, 128)
    if avail < per_lane * 128:
        # TODO(synk): frames whose resident source copies alone exhaust VMEM
        # would need a flow-bounded source-row tiling (sparsity) pass.
        tq = 128
    else:
        tq = (avail // per_lane) // 128 * 128
        tq = max(128, min(tq, q_lanes, 8192))
    qpad = _round_up(Q, tq)
    nj = qpad // tq
    vmem_limit = int(min(max(fixed + per_lane * tq + headroom, 16 << 20), budget))
    return tq, qpad, nj, vmem_limit


def warp_loss_v2(gt_frames, flow_backwards, flow_forwards, weight=None,
                 loss_weight=1.0, reduction='mean', matmul_dtype=jnp.bfloat16):
    if weight is not None:
        # TODO(synk): element-wise weights would need a weight input per slab.
        raise NotImplementedError("element-wise `weight` is not supported")
    if reduction not in ('mean', 'sum'):
        # TODO(synk): reduction='none' needs per-element maps; this reduce-only
        # kernel supports 'mean'/'sum'.
        raise NotImplementedError(f"reduction='{reduction}' is not supported")

    n, t, c, h, w = gt_frames.shape
    assert h % 4 == 0 and w % 4 == 0, "spatial dims must be divisible by 4"
    H4, W4 = h // 4, w // 4
    Q = H4 * W4
    B = n * (t - 1)

    # 4x4 adaptive average pool (== uniform 4x4 mean when divisible) in f32.
    lqs_1 = gt_frames[:, :-1].reshape(B, c, h, w).astype(jnp.float32)
    lqs_2 = gt_frames[:, 1:].reshape(B, c, h, w).astype(jnp.float32)
    pool = lambda x: x.reshape(B, c, H4, 4, W4, 4).mean(axis=(3, 5))
    p1 = pool(lqs_1)                                   # (B, c, H4, W4) f32
    p2 = pool(lqs_2)

    src_itemsize = jnp.dtype(matmul_dtype).itemsize
    TQ, Qpad, NJ, vmem_limit = _choose_tiling(H4, W4, c, src_itemsize)
    assert Qpad < (1 << 24), "pooled spatial size too large for f32 indexing"

    # Source-layout copies for the per-channel MXU contraction over x; the
    # j-invariant cast to the matmul dtype is hoisted out of the kernel.
    x1_src = p1.astype(matmul_dtype)
    x2_src = p2.astype(matmul_dtype)

    # Target / flow copies with the flattened spatial axis in lanes, zero
    # padded to a multiple of TQ (padded pixels contribute exactly zero).
    def flat_pad(a):                                   # (B, k, H4, W4) -> (B, k, Qpad)
        a = a.reshape(B, a.shape[1], Q)
        if Qpad > Q:
            a = jnp.pad(a, ((0, 0), (0, 0), (0, Qpad - Q)))
        return a

    x1_tgt = flat_pad(p1)
    x2_tgt = flat_pad(p2)
    ff = flat_pad(flow_forwards.reshape(B, 2, H4, W4).astype(jnp.float32))
    fb = flat_pad(flow_backwards.reshape(B, 2, H4, W4).astype(jnp.float32))

    kernel = functools.partial(_warp_loss_kernel, C=c, H4=H4, W4=W4, TQ=TQ,
                               matmul_dtype=matmul_dtype)
    sum_f, sum_b = pl.pallas_call(
        kernel,
        out_shape=(jax.ShapeDtypeStruct((B, 1, TQ), jnp.float32),
                   jax.ShapeDtypeStruct((B, 1, TQ), jnp.float32)),
        grid_spec=pltpu.PrefetchScalarGridSpec(
            num_scalar_prefetch=0,
            grid=(B, NJ),
            in_specs=[
                pl.BlockSpec((1, c, H4, W4), lambda b, j: (b, 0, 0, 0)),  # x1 src
                pl.BlockSpec((1, c, H4, W4), lambda b, j: (b, 0, 0, 0)),  # x2 src
                pl.BlockSpec((1, c, TQ), lambda b, j: (b, 0, j)),         # x1 tgt
                pl.BlockSpec((1, c, TQ), lambda b, j: (b, 0, j)),         # x2 tgt
                pl.BlockSpec((1, 2, TQ), lambda b, j: (b, 0, j)),         # fwd flow
                pl.BlockSpec((1, 2, TQ), lambda b, j: (b, 0, j)),         # bwd flow
            ],
            out_specs=(pl.BlockSpec((1, 1, TQ), lambda b, j: (b, 0, 0)),
                       pl.BlockSpec((1, 1, TQ), lambda b, j: (b, 0, 0))),
        ),
        compiler_params=pltpu.CompilerParams(
            dimension_semantics=("parallel", "arbitrary"),
            vmem_limit_bytes=vmem_limit),
    )(x1_src, x2_src, x1_tgt, x2_tgt, ff, fb)

    # Per-batch, per-lane partial sums -> final reduction in f32 here.
    total_f = jnp.sum(sum_f)
    total_b = jnp.sum(sum_b)
    count = B * c * Q
    if reduction == 'mean':
        lf = total_f / count
        lb = total_b / count
    else:                                              # 'sum'
        lf = total_f
        lb = total_b
    return loss_weight * (0.5 * lf + 0.5 * lb)


def _reference(gt_frames, flow_backwards, flow_forwards, loss_weight=1.0):
    """Pure-JAX f32 reference mirroring the PyTorch forward (mean reduction)."""
    n, t, c, h, w = gt_frames.shape
    H4, W4 = h // 4, w // 4
    B = n * (t - 1)
    lqs_1 = gt_frames[:, :-1].reshape(B, c, h, w)
    lqs_2 = gt_frames[:, 1:].reshape(B, c, h, w)
    pool = lambda x: x.reshape(B, c, H4, 4, W4, 4).mean(axis=(3, 5))
    p1 = pool(lqs_1)
    p2 = pool(lqs_2)
    ff = flow_forwards.reshape(B, 2, H4, W4).transpose(0, 2, 3, 1)
    fb = flow_backwards.reshape(B, 2, H4, W4).transpose(0, 2, 3, 1)

    def flow_warp(x, flow):
        Bn, C, H, W = x.shape
        gy, gx = jnp.meshgrid(jnp.arange(H, dtype=jnp.float32),
                              jnp.arange(W, dtype=jnp.float32), indexing='ij')
        sx = gx[None] + flow[..., 0]
        sy = gy[None] + flow[..., 1]
        x0 = jnp.floor(sx); x1_ = x0 + 1
        y0 = jnp.floor(sy); y1_ = y0 + 1
        wx1 = sx - x0; wx0 = 1 - wx1
        wy1 = sy - y0; wy0 = 1 - wy1

        def gather(xi, yi):
            valid = (xi >= 0) & (xi <= W - 1) & (yi >= 0) & (yi <= H - 1)
            xi_c = jnp.clip(xi, 0, W - 1).astype(jnp.int32)
            yi_c = jnp.clip(yi, 0, H - 1).astype(jnp.int32)
            idx = (yi_c * W + xi_c).reshape(Bn, 1, H * W)
            g = jnp.take_along_axis(x.reshape(Bn, C, H * W), idx, axis=2)
            return g.reshape(Bn, C, H, W) * valid[:, None].astype(x.dtype)

        return (gather(x0, y0) * (wx0 * wy0)[:, None]
                + gather(x1_, y0) * (wx1 * wy0)[:, None]
                + gather(x0, y1_) * (wx0 * wy1)[:, None]
                + gather(x1_, y1_) * (wx1 * wy1)[:, None])

    lf = jnp.mean(jnp.abs(flow_warp(p1, ff) - p2))
    lb = jnp.mean(jnp.abs(flow_warp(p2, fb) - p1))
    return loss_weight * (0.5 * lf + 0.5 * lb)


if __name__ == "__main__":
    key = jax.random.PRNGKey(0)
    n, t, c, h, w = 2, 3, 4, 16, 16
    k1, k2, k3 = jax.random.split(key, 3)
    gt_frames = jax.random.uniform(k1, (n, t, c, h, w), jnp.float32)
    flow_forwards = jax.random.normal(k2, (n, t - 1, 2, h // 4, w // 4),
                                      jnp.float32) * 1.5
    flow_backwards = jax.random.normal(k3, (n, t - 1, 2, h // 4, w // 4),
                                       jnp.float32) * 1.5

    loss = warp_loss_v2(gt_frames, flow_backwards, flow_forwards,
                        loss_weight=1.0, reduction='mean')
    loss = jax.block_until_ready(loss)

    ref = _reference(gt_frames, flow_backwards, flow_forwards, loss_weight=1.0)
    # Tolerance loosened vs the f32 reference: the source frames and the
    # x-direction tent weights are cast to bf16 for the MXU contraction
    # (f32 accumulation); the y-direction contraction and all coordinate /
    # weight math stay f32.
    assert np.allclose(np.asarray(loss), np.asarray(ref),
                       rtol=2e-2, atol=1e-3), (loss, ref)
    print("KERNEL_OK")
</pallas_src>

<mosaic_0001>
module attributes {stable_mosaic.version = 11 : i64} {
  func.func @_warp_loss_kernel(%arg0: i32, %arg1: i32, %arg2: memref<1x4x4x4xbf16, #tpu.memory_space<vmem>>, %arg3: memref<1x4x4x4xbf16, #tpu.memory_space<vmem>>, %arg4: memref<1x4x128xf32, #tpu.memory_space<vmem>>, %arg5: memref<1x4x128xf32, #tpu.memory_space<vmem>>, %arg6: memref<1x2x128xf32, #tpu.memory_space<vmem>>, %arg7: memref<1x2x128xf32, #tpu.memory_space<vmem>>, %arg8: memref<1x1x128xf32, #tpu.memory_space<vmem>>, %arg9: memref<1x1x128xf32, #tpu.memory_space<vmem>>) attributes {dimension_semantics = [#tpu.dimension_semantics<parallel>, #tpu.dimension_semantics<arbitrary>], iteration_bounds = array<i64: 4, 1>, scalar_prefetch = 0 : i64, scratch_operands = 0 : i64, tpu.core_type = #tpu.core_type<tc>, window_params = [{transform_indices = @transform_0, window_bounds = array<i64: 1, 4, 4, 4>}, {transform_indices = @transform_1, window_bounds = array<i64: 1, 4, 4, 4>}, {transform_indices = @transform_2, window_bounds = array<i64: 1, 4, 128>}, {transform_indices = @transform_3, window_bounds = array<i64: 1, 4, 128>}, {transform_indices = @transform_4, window_bounds = array<i64: 1, 2, 128>}, {transform_indices = @transform_5, window_bounds = array<i64: 1, 2, 128>}, {transform_indices = @transform_6, window_bounds = array<i64: 1, 1, 128>}, {transform_indices = @transform_7, window_bounds = array<i64: 1, 1, 128>}]} {
    %c0_i32 = arith.constant 0 : i32
    %0 = arith.cmpi eq, %arg1, %c0_i32 : i32
    %1 = arith.extui %0 : i1 to i32
    %c0_i32_0 = arith.constant 0 : i32
    %2 = arith.cmpi ne, %1, %c0_i32_0 : i32
    scf.if %2 {
      %cst_80 = arith.constant 0.000000e+00 : f32
      %158 = vector.broadcast %cst_80 : f32 to vector<1x1x128xf32>
      %c0_81 = arith.constant 0 : index
      %c0_82 = arith.constant 0 : index
      %c0_83 = arith.constant 0 : index
      %159 = vector.load %arg8[%c0_81, %c0_82, %c0_83] : memref<1x1x128xf32, #tpu.memory_space<vmem>>, vector<1x1x128xf32>
      tpu.vector_store %arg8[%c0_81, %c0_82, %c0_83], %158 {strides = array<i32>} : memref<1x1x128xf32, #tpu.memory_space<vmem>>, vector<1x1x128xf32>,
      %cst_84 = arith.constant 0.000000e+00 : f32
      %160 = vector.broadcast %cst_84 : f32 to vector<1x1x128xf32>
      %c0_85 = arith.constant 0 : index
      %c0_86 = arith.constant 0 : index
      %c0_87 = arith.constant 0 : index
      %161 = vector.load %arg9[%c0_85, %c0_86, %c0_87] : memref<1x1x128xf32, #tpu.memory_space<vmem>>, vector<1x1x128xf32>
      tpu.vector_store %arg9[%c0_85, %c0_86, %c0_87], %160 {strides = array<i32>} : memref<1x1x128xf32, #tpu.memory_space<vmem>>, vector<1x1x128xf32>,
    } else {
    }
    %3 = tpu.iota {dimensions = array<i32: 0>} : vector<4x1xi32>
    %4 = arith.sitofp %3 : vector<4x1xi32> to vector<4x1xf32>
    %5 = tpu.iota {dimensions = array<i32: 0>} : vector<4x1xi32>
    %6 = arith.sitofp %5 : vector<4x1xi32> to vector<4x1xf32>
    %7 = tpu.iota {dimensions = array<i32: 1>} : vector<1x128xi32>
    %c128_i32 = arith.constant 128 : i32
    %8 = arith.muli %arg1, %c128_i32 : i32
    %9 = vector.broadcast %8 : i32 to vector<1x128xi32>
    %10 = arith.addi %7, %9 : vector<1x128xi32>
    %11 = arith.sitofp %10 : vector<1x128xi32> to vector<1x128xf32>
    %cst = arith.constant 4.000000e+00 : f32
    %12 = vector.broadcast %cst : f32 to vector<1x128xf32>
    %13 = arith.divf %11, %12 : vector<1x128xf32>
    %14 = math.floor %13 : vector<1x128xf32>
    %cst_1 = arith.constant 4.000000e+00 : f32
    %15 = vector.broadcast %cst_1 : f32 to vector<1x128xf32>
    %16 = arith.mulf %14, %15 : vector<1x128xf32>
    %17 = arith.subf %11, %16 : vector<1x128xf32>
    %c0 = arith.constant 0 : index
    %c0_2 = arith.constant 0 : index
    %c0_3 = arith.constant 0 : index
    %18 = vector.load %arg6[%c0, %c0_2, %c0_3] : memref<1x2x128xf32, #tpu.memory_space<vmem>>, vector<1x2x128xf32>
    %19 = vector.shape_cast %18 : vector<1x2x128xf32> to vector<2x128xf32>
    %20 = vector.extract_strided_slice %19 {offsets = [0, 0], sizes = [1, 128], strides = [1, 1]} : vector<2x128xf32> to vector<1x128xf32>
    %21 = arith.addf %17, %20 : vector<1x128xf32>
    %22 = vector.extract_strided_slice %19 {offsets = [1, 0], sizes = [1, 128], strides = [1, 1]} : vector<2x128xf32> to vector<1x128xf32>
    %23 = arith.addf %14, %22 : vector<1x128xf32>
    %24 = vector.broadcast %4 : vector<4x1xf32> to vector<4x128xf32>
    %25 = vector.broadcast %21 : vector<1x128xf32> to vector<4x128xf32>
    %26 = arith.subf %24, %25 : vector<4x128xf32>
    %27 = math.absf %26 : vector<4x128xf32>
    %cst_4 = arith.constant 1.000000e+00 : f32
    %28 = vector.broadcast %cst_4 : f32 to vector<4x128xf32>
    %29 = arith.subf %28, %27 : vector<4x128xf32>
    %cst_5 = arith.constant 0.000000e+00 : f32
    %30 = vector.broadcast %cst_5 : f32 to vector<4x128xf32>
    %31 = arith.maximumf %29, %30 : vector<4x128xf32>
    %32 = vector.broadcast %6 : vector<4x1xf32> to vector<4x128xf32>
    %33 = vector.broadcast %23 : vector<1x128xf32> to vector<4x128xf32>
    %34 = arith.subf %32, %33 : vector<4x128xf32>
    %35 = math.absf %34 : vector<4x128xf32>
    %cst_6 = arith.constant 1.000000e+00 : f32
    %36 = vector.broadcast %cst_6 : f32 to vector<4x128xf32>
    %37 = arith.subf %36, %35 : vector<4x128xf32>
    %cst_7 = arith.constant 0.000000e+00 : f32
    %38 = vector.broadcast %cst_7 : f32 to vector<4x128xf32>
    %39 = arith.maximumf %37, %38 : vector<4x128xf32>
    %40 = arith.truncf %31 : vector<4x128xf32> to vector<4x128xbf16>
    %c0_8 = arith.constant 0 : index
    %c0_9 = arith.constant 0 : index
    %c0_10 = arith.constant 0 : index
    %41 = vector.load %arg5[%c0_8, %c0_9, %c0_10] : memref<1x4x128xf32, #tpu.memory_space<vmem>>, vector<1x4x128xf32>
    %42 = vector.shape_cast %41 : vector<1x4x128xf32> to vector<4x128xf32>
    %cst_11 = arith.constant 0.000000e+00 : f32
    %43 = vector.broadcast %cst_11 : f32 to vector<1x128xf32>
    %c0_12 = arith.constant 0 : index
    %c0_13 = arith.constant 0 : index
    %c0_14 = arith.constant 0 : index
    %c0_15 = arith.constant 0 : index
    %44 = vector.load %arg2[%c0_12, %c0_13, %c0_14, %c0_15] : memref<1x4x4x4xbf16, #tpu.memory_space<vmem>>, vector<1x1x4x4xbf16>
    %45 = vector.shape_cast %44 : vector<1x1x4x4xbf16> to vector<4x4xbf16>
    %cst_16 = arith.constant dense<0.000000e+00> : vector<4x128xf32>
    %46 = tpu.matmul %45, %40, %cst_16 {dimension_numbers = #tpu.dot_dimension_numbers<[1], [0], [0], [1], [0, 0, 1, 1], [], []>} : vector<4x4xbf16>, vector<4x128xbf16>, vector<4x128xf32> -> vector<4x128xf32>
    %47 = arith.mulf %46, %39 : vector<4x128xf32>
    %cst_17 = arith.constant dense<0.000000e+00> : vector<128xf32>
    %48 = vector.multi_reduction <add>, %47, %cst_17 [0] : vector<4x128xf32> to vector<128xf32>
    %49 = vector.shape_cast %48 : vector<128xf32> to vector<1x128xf32>
    %50 = vector.extract_strided_slice %42 {offsets = [0, 0], sizes = [1, 128], strides = [1, 1]} : vector<4x128xf32> to vector<1x128xf32>
    %51 = arith.subf %49, %50 : vector<1x128xf32>
    %52 = math.absf %51 : vector<1x128xf32>
    %53 = arith.addf %43, %52 : vector<1x128xf32>
    %c0_18 = arith.constant 0 : index
    %c1 = arith.constant 1 : index
    %c0_19 = arith.constant 0 : index
    %c0_20 = arith.constant 0 : index
    %54 = vector.load %arg2[%c0_18, %c1, %c0_19, %c0_20] : memref<1x4x4x4xbf16, #tpu.memory_space<vmem>>, vector<1x1x4x4xbf16>
    %55 = vector.shape_cast %54 : vector<1x1x4x4xbf16> to vector<4x4xbf16>
    %cst_21 = arith.constant dense<0.000000e+00> : vector<4x128xf32>
    %56 = tpu.matmul %55, %40, %cst_21 {dimension_numbers = #tpu.dot_dimension_numbers<[1], [0], [0], [1], [0, 0, 1, 1], [], []>} : vector<4x4xbf16>, vector<4x128xbf16>, vector<4x128xf32> -> vector<4x128xf32>
    %57 = arith.mulf %56, %39 : vector<4x128xf32>
    %cst_22 = arith.constant dense<0.000000e+00> : vector<128xf32>
    %58 = vector.multi_reduction <add>, %57, %cst_22 [0] : vector<4x128xf32> to vector<128xf32>
    %59 = vector.shape_cast %58 : vector<128xf32> to vector<1x128xf32>
    %60 = vector.extract_strided_slice %42 {offsets = [1, 0], sizes = [1, 128], strides = [1, 1]} : vector<4x128xf32> to vector<1x128xf32>
    %61 = arith.subf %59, %60 : vector<1x128xf32>
    %62 = math.absf %61 : vector<1x128xf32>
    %63 = arith.addf %53, %62 : vector<1x128xf32>
    %c0_23 = arith.constant 0 : index
    %c2 = arith.constant 2 : index
    %c0_24 = arith.constant 0 : index
    %c0_25 = arith.constant 0 : index
    %64 = vector.load %arg2[%c0_23, %c2, %c0_24, %c0_25] : memref<1x4x4x4xbf16, #tpu.memory_space<vmem>>, vector<1x1x4x4xbf16>
    %65 = vector.shape_cast %64 : vector<1x1x4x4xbf16> to vector<4x4xbf16>
    %cst_26 = arith.constant dense<0.000000e+00> : vector<4x128xf32>
    %66 = tpu.matmul %65, %40, %cst_26 {dimension_numbers = #tpu.dot_dimension_numbers<[1], [0], [0], [1], [0, 0, 1, 1], [], []>} : vector<4x4xbf16>, vector<4x128xbf16>, vector<4x128xf32> -> vector<4x128xf32>
    %67 = arith.mulf %66, %39 : vector<4x128xf32>
    %cst_27 = arith.constant dense<0.000000e+00> : vector<128xf32>
    %68 = vector.multi_reduction <add>, %67, %cst_27 [0] : vector<4x128xf32> to vector<128xf32>
    %69 = vector.shape_cast %68 : vector<128xf32> to vector<1x128xf32>
    %70 = vector.extract_strided_slice %42 {offsets = [2, 0], sizes = [1, 128], strides = [1, 1]} : vector<4x128xf32> to vector<1x128xf32>
    %71 = arith.subf %69, %70 : vector<1x128xf32>
    %72 = math.absf %71 : vector<1x128xf32>
    %73 = arith.addf %63, %72 : vector<1x128xf32>
    %c0_28 = arith.constant 0 : index
    %c3 = arith.constant 3 : index
    %c0_29 = arith.constant 0 : index
    %c0_30 = arith.constant 0 : index
    %74 = vector.load %arg2[%c0_28, %c3, %c0_29, %c0_30] : memref<1x4x4x4xbf16, #tpu.memory_space<vmem>>, vector<1x1x4x4xbf16>
    %75 = vector.shape_cast %74 : vector<1x1x4x4xbf16> to vector<4x4xbf16>
    %cst_31 = arith.constant dense<0.000000e+00> : vector<4x128xf32>
    %76 = tpu.matmul %75, %40, %cst_31 {dimension_numbers = #tpu.dot_dimension_numbers<[1], [0], [0], [1], [0, 0, 1, 1], [], []>} : vector<4x4xbf16>, vector<4x128xbf16>, vector<4x128xf32> -> vector<4x128xf32>
    %77 = arith.mulf %76, %39 : vector<4x128xf32>
    %cst_32 = arith.constant dense<0.000000e+00> : vector<128xf32>
    %78 = vector.multi_reduction <add>, %77, %cst_32 [0] : vector<4x128xf32> to vector<128xf32>
    %79 = vector.shape_cast %78 : vector<128xf32> to vector<1x128xf32>
    %80 = vector.extract_strided_slice %42 {offsets = [3, 0], sizes = [1, 128], strides = [1, 1]} : vector<4x128xf32> to vector<1x128xf32>
    %81 = arith.subf %79, %80 : vector<1x128xf32>
    %82 = math.absf %81 : vector<1x128xf32>
    %83 = arith.addf %73, %82 : vector<1x128xf32>
    %c0_33 = arith.constant 0 : index
    %c0_34 = arith.constant 0 : index
    %c0_35 = arith.constant 0 : index
    %84 = vector.load %arg8[%c0_33, %c0_34, %c0_35] : memref<1x1x128xf32, #tpu.memory_space<vmem>>, vector<1x1x128xf32>
    %85 = vector.shape_cast %83 : vector<1x128xf32> to vector<1x1x128xf32>
    %86 = arith.addf %84, %85 : vector<1x1x128xf32>
    %c0_36 = arith.constant 0 : index
    %c0_37 = arith.constant 0 : index
    %c0_38 = arith.constant 0 : index
    %87 = vector.load %arg8[%c0_36, %c0_37, %c0_38] : memref<1x1x128xf32, #tpu.memory_space<vmem>>, vector<1x1x128xf32>
    tpu.vector_store %arg8[%c0_36, %c0_37, %c0_38], %86 {strides = array<i32>} : memref<1x1x128xf32, #tpu.memory_space<vmem>>, vector<1x1x128xf32>,
    %c0_39 = arith.constant 0 : index
    %c0_40 = arith.constant 0 : index
    %c0_41 = arith.constant 0 : index
    %88 = vector.load %arg7[%c0_39, %c0_40, %c0_41] : memref<1x2x128xf32, #tpu.memory_space<vmem>>, vector<1x2x128xf32>
    %89 = vector.shape_cast %88 : vector<1x2x128xf32> to vector<2x128xf32>
    %90 = vector.extract_strided_slice %89 {offsets = [0, 0], sizes = [1, 128], strides = [1, 1]} : vector<2x128xf32> to vector<1x128xf32>
    %91 = arith.addf %17, %90 : vector<1x128xf32>
    %92 = vector.extract_strided_slice %89 {offsets = [1, 0], sizes = [1, 128], strides = [1, 1]} : vector<2x128xf32> to vector<1x128xf32>
    %93 = arith.addf %14, %92 : vector<1x128xf32>
    %94 = vector.broadcast %4 : vector<4x1xf32> to vector<4x128xf32>
    %95 = vector.broadcast %91 : vector<1x128xf32> to vector<4x128xf32>
    %96 = arith.subf %94, %95 : vector<4x128xf32>
    %97 = math.absf %96 : vector<4x128xf32>
    %cst_42 = arith.constant 1.000000e+00 : f32
    %98 = vector.broadcast %cst_42 : f32 to vector<4x128xf32>
    %99 = arith.subf %98, %97 : vector<4x128xf32>
    %cst_43 = arith.constant 0.000000e+00 : f32
    %100 = vector.broadcast %cst_43 : f32 to vector<4x128xf32>
    %101 = arith.maximumf %99, %100 : vector<4x128xf32>
    %102 = vector.broadcast %6 : vector<4x1xf32> to vector<4x128xf32>
    %103 = vector.broadcast %93 : vector<1x128xf32> to vector<4x128xf32>
    %104 = arith.subf %102, %103 : vector<4x128xf32>
    %105 = math.absf %104 : vector<4x128xf32>
    %cst_44 = arith.constant 1.000000e+00 : f32
    %106 = vector.broadcast %cst_44 : f32 to vector<4x128xf32>
    %107 = arith.subf %106, %105 : vector<4x128xf32>
    %cst_45 = arith.constant 0.000000e+00 : f32
    %108 = vector.broadcast %cst_45 : f32 to vector<4x128xf32>
    %109 = arith.maximumf %107, %108 : vector<4x128xf32>
    %110 = arith.truncf %101 : vector<4x128xf32> to vector<4x128xbf16>
    %c0_46 = arith.constant 0 : index
    %c0_47 = arith.constant 0 : index
    %c0_48 = arith.constant 0 : index
    %111 = vector.load %arg4[%c0_46, %c0_47, %c0_48] : memref<1x4x128xf32, #tpu.memory_space<vmem>>, vector<1x4x128xf32>
    %112 = vector.shape_cast %111 : vector<1x4x128xf32> to vector<4x128xf32>
    %cst_49 = arith.constant 0.000000e+00 : f32
    %113 = vector.broadcast %cst_49 : f32 to vector<1x128xf32>
    %c0_50 = arith.constant 0 : index
    %c0_51 = arith.constant 0 : index
    %c0_52 = arith.constant 0 : index
    %c0_53 = arith.constant 0 : index
    %114 = vector.load %arg3[%c0_50, %c0_51, %c0_52, %c0_53] : memref<1x4x4x4xbf16, #tpu.memory_space<vmem>>, vector<1x1x4x4xbf16>
    %115 = vector.shape_cast %114 : vector<1x1x4x4xbf16> to vector<4x4xbf16>
    %cst_54 = arith.constant dense<0.000000e+00> : vector<4x128xf32>
    %116 = tpu.matmul %115, %110, %cst_54 {dimension_numbers = #tpu.dot_dimension_numbers<[1], [0], [0], [1], [0, 0, 1, 1], [], []>} : vector<4x4xbf16>, vector<4x128xbf16>, vector<4x128xf32> -> vector<4x128xf32>
    %117 = arith.mulf %116, %109 : vector<4x128xf32>
    %cst_55 = arith.constant dense<0.000000e+00> : vector<128xf32>
    %118 = vector.multi_reduction <add>, %117, %cst_55 [0] : vector<4x128xf32> to vector<128xf32>
    %119 = vector.shape_cast %118 : vector<128xf32> to vector<1x128xf32>
    %120 = vector.extract_strided_slice %112 {offsets = [0, 0], sizes = [1, 128], strides = [1, 1]} : vector<4x128xf32> to vector<1x128xf32>
    %121 = arith.subf %119, %120 : vector<1x128xf32>
    %122 = math.absf %121 : vector<1x128xf32>
    %123 = arith.addf %113, %122 : vector<1x128xf32>
    %c0_56 = arith.constant 0 : index
    %c1_57 = arith.constant 1 : index
    %c0_58 = arith.constant 0 : index
    %c0_59 = arith.constant 0 : index
    %124 = vector.load %arg3[%c0_56, %c1_57, %c0_58, %c0_59] : memref<1x4x4x4xbf16, #tpu.memory_space<vmem>>, vector<1x1x4x4xbf16>
    %125 = vector.shape_cast %124 : vector<1x1x4x4xbf16> to vector<4x4xbf16>
    %cst_60 = arith.constant dense<0.000000e+00> : vector<4x128xf32>
    %126 = tpu.matmul %125, %110, %cst_60 {dimension_numbers = #tpu.dot_dimension_numbers<[1], [0], [0], [1], [0, 0, 1, 1], [], []>} : vector<4x4xbf16>, vector<4x128xbf16>, vector<4x128xf32> -> vector<4x128xf32>
    %127 = arith.mulf %126, %109 : vector<4x128xf32>
    %cst_61 = arith.constant dense<0.000000e+00> : vector<128xf32>
    %128 = vector.multi_reduction <add>, %127, %cst_61 [0] : vector<4x128xf32> to vector<128xf32>
    %129 = vector.shape_cast %128 : vector<128xf32> to vector<1x128xf32>
    %130 = vector.extract_strided_slice %112 {offsets = [1, 0], sizes = [1, 128], strides = [1, 1]} : vector<4x128xf32> to vector<1x128xf32>
    %131 = arith.subf %129, %130 : vector<1x128xf32>
    %132 = math.absf %131 : vector<1x128xf32>
    %133 = arith.addf %123, %132 : vector<1x128xf32>
    %c0_62 = arith.constant 0 : index
    %c2_63 = arith.constant 2 : index
    %c0_64 = arith.constant 0 : index
    %c0_65 = arith.constant 0 : index
    %134 = vector.load %arg3[%c0_62, %c2_63, %c0_64, %c0_65] : memref<1x4x4x4xbf16, #tpu.memory_space<vmem>>, vector<1x1x4x4xbf16>
    %135 = vector.shape_cast %134 : vector<1x1x4x4xbf16> to vector<4x4xbf16>
    %cst_66 = arith.constant dense<0.000000e+00> : vector<4x128xf32>
    %136 = tpu.matmul %135, %110, %cst_66 {dimension_numbers = #tpu.dot_dimension_numbers<[1], [0], [0], [1], [0, 0, 1, 1], [], []>} : vector<4x4xbf16>, vector<4x128xbf16>, vector<4x128xf32> -> vector<4x128xf32>
    %137 = arith.mulf %136, %109 : vector<4x128xf32>
    %cst_67 = arith.constant dense<0.000000e+00> : vector<128xf32>
    %138 = vector.multi_reduction <add>, %137, %cst_67 [0] : vector<4x128xf32> to vector<128xf32>
    %139 = vector.shape_cast %138 : vector<128xf32> to vector<1x128xf32>
    %140 = vector.extract_strided_slice %112 {offsets = [2, 0], sizes = [1, 128], strides = [1, 1]} : vector<4x128xf32> to vector<1x128xf32>
    %141 = arith.subf %139, %140 : vector<1x128xf32>
    %142 = math.absf %141 : vector<1x128xf32>
    %143 = arith.addf %133, %142 : vector<1x128xf32>
    %c0_68 = arith.constant 0 : index
    %c3_69 = arith.constant 3 : index
    %c0_70 = arith.constant 0 : index
    %c0_71 = arith.constant 0 : index
    %144 = vector.load %arg3[%c0_68, %c3_69, %c0_70, %c0_71] : memref<1x4x4x4xbf16, #tpu.memory_space<vmem>>, vector<1x1x4x4xbf16>
    %145 = vector.shape_cast %144 : vector<1x1x4x4xbf16> to vector<4x4xbf16>
    %cst_72 = arith.constant dense<0.000000e+00> : vector<4x128xf32>
    %146 = tpu.matmul %145, %110, %cst_72 {dimension_numbers = #tpu.dot_dimension_numbers<[1], [0], [0], [1], [0, 0, 1, 1], [], []>} : vector<4x4xbf16>, vector<4x128xbf16>, vector<4x128xf32> -> vector<4x128xf32>
    %147 = arith.mulf %146, %109 : vector<4x128xf32>
    %cst_73 = arith.constant dense<0.000000e+00> : vector<128xf32>
    %148 = vector.multi_reduction <add>, %147, %cst_73 [0] : vector<4x128xf32> to vector<128xf32>
    %149 = vector.shape_cast %148 : vector<128xf32> to vector<1x128xf32>
    %150 = vector.extract_strided_slice %112 {offsets = [3, 0], sizes = [1, 128], strides = [1, 1]} : vector<4x128xf32> to vector<1x128xf32>
    %151 = arith.subf %149, %150 : vector<1x128xf32>
    %152 = math.absf %151 : vector<1x128xf32>
    %153 = arith.addf %143, %152 : vector<1x128xf32>
    %c0_74 = arith.constant 0 : index
    %c0_75 = arith.constant 0 : index
    %c0_76 = arith.constant 0 : index
    %154 = vector.load %arg9[%c0_74, %c0_75, %c0_76] : memref<1x1x128xf32, #tpu.memory_space<vmem>>, vector<1x1x128xf32>
    %155 = vector.shape_cast %153 : vector<1x128xf32> to vector<1x1x128xf32>
    %156 = arith.addf %154, %155 : vector<1x1x128xf32>
    %c0_77 = arith.constant 0 : index
    %c0_78 = arith.constant 0 : index
    %c0_79 = arith.constant 0 : index
    %157 = vector.load %arg9[%c0_77, %c0_78, %c0_79] : memref<1x1x128xf32, #tpu.memory_space<vmem>>, vector<1x1x128xf32>
    tpu.vector_store %arg9[%c0_77, %c0_78, %c0_79], %156 {strides = array<i32>} : memref<1x1x128xf32, #tpu.memory_space<vmem>>, vector<1x1x128xf32>,
    return
  }
  func.func @transform_0(%arg0: i32, %arg1: i32) -> (i32, i32, i32, i32) {
    %c0_i32 = arith.constant 0 : i32
    %c0_i32_0 = arith.constant 0 : i32
    %c0_i32_1 = arith.constant 0 : i32
    %c0_i32_2 = arith.constant 0 : i32
    return %arg0, %c0_i32, %c0_i32_0, %c0_i32_1 : i32, i32, i32, i32
  }
  func.func @transform_1(%arg0: i32, %arg1: i32) -> (i32, i32, i32, i32) {
    %c0_i32 = arith.constant 0 : i32
    %c0_i32_0 = arith.constant 0 : i32
    %c0_i32_1 = arith.constant 0 : i32
    %c0_i32_2 = arith.constant 0 : i32
    return %arg0, %c0_i32, %c0_i32_0, %c0_i32_1 : i32, i32, i32, i32
  }
  func.func @transform_2(%arg0: i32, %arg1: i32) -> (i32, i32, i32) {
    %c0_i32 = arith.constant 0 : i32
    %c0_i32_0 = arith.constant 0 : i32
    return %arg0, %c0_i32, %arg1 : i32, i32, i32
  }
  func.func @transform_3(%arg0: i32, %arg1: i32) -> (i32, i32, i32) {
    %c0_i32 = arith.constant 0 : i32
    %c0_i32_0 = arith.constant 0 : i32
    return %arg0, %c0_i32, %arg1 : i32, i32, i32
  }
  func.func @transform_4(%arg0: i32, %arg1: i32) -> (i32, i32, i32) {
    %c0_i32 = arith.constant 0 : i32
    %c0_i32_0 = arith.constant 0 : i32
    return %arg0, %c0_i32, %arg1 : i32, i32, i32
  }
  func.func @transform_5(%arg0: i32, %arg1: i32) -> (i32, i32, i32) {
    %c0_i32 = arith.constant 0 : i32
    %c0_i32_0 = arith.constant 0 : i32
    return %arg0, %c0_i32, %arg1 : i32, i32, i32
  }
  func.func @transform_6(%arg0: i32, %arg1: i32) -> (i32, i32, i32) {
    %c0_i32 = arith.constant 0 : i32
    %c0_i32_0 = arith.constant 0 : i32
    %c0_i32_1 = arith.constant 0 : i32
    return %arg0, %c0_i32, %c0_i32_0 : i32, i32, i32
  }
  func.func @transform_7(%arg0: i32, %arg1: i32) -> (i32, i32, i32) {
    %c0_i32 = arith.constant 0 : i32
    %c0_i32_0 = arith.constant 0 : i32
    %c0_i32_1 = arith.constant 0 : i32
    return %arg0, %c0_i32, %c0_i32_0 : i32, i32, i32
  }
}

</mosaic_0001>

<bundles_post_ra>
// kernel: tpu_custom_call.1
= control target key start
LH: loop header
LB: loop body
LE: loop exit
PB: predicated region body
PF: predicated region fallthrough
CT: control target
= control target key end

     0   :  { %s2174_s0 = inlined_call_operand.hbm [shape: bf16[4,4,4,4], index: 0, kind: input, shape index: {}]   ;;  %s2175_s1 = inlined_call_operand.hbm [shape: bf16[4,4,4,4], index: 1, kind: input, shape index: {}]   ;;  %s2176_s2 = inlined_call_operand.hbm [shape: f32[4,4,128], index: 2, kind: input, shape index: {}]   ;;  %s2177_s3 = inlined_call_operand.hbm [shape: f32[4,4,128], index: 3, kind: input, shape index: {}]   ;;  %s2178_s4 = inlined_call_operand.vmem [shape: f32[4,2,128], index: 4, kind: input, shape index: {}]   ;;  %s2179_s5 = inlined_call_operand.vmem [shape: f32[4,2,128], index: 5, kind: input, shape index: {}]   ;;  %s2180_s6 = inlined_call_operand.hbm [shape: f32[4,1,128], index: 6, kind: output, shape index: {0}]   ;;  %s2181_s7 = inlined_call_operand.hbm [shape: f32[4,1,128], index: 7, kind: output, shape index: {1}]  }
   0x1   :  { %2198 = sst [smem:[#allocation24_spill]] %s2174_s0 }
   0x2   :  { %2199 = sst [smem:[#allocation25_spill]] %s2175_s1 }
   0x3   :  { %2200 = sst [smem:[#allocation26_spill]] %s2180_s6 }
   0x4   :  { %2201 = sst [smem:[#allocation27_spill]] %s2181_s7 }
   0x5   :  { %13 = vsyncpa [#allocation3], 0 }
   0x6   :  { %15 = vsyncpa [#allocation3 + $0x1], 0 }
   0x7   :  { %16 = vsyncpa [#allocation6], 0 }
   0x8   :  { %18 = vsyncpa [#allocation6 + $0x1], 0 }
   0x9   :  { %19 = vsyncpa [#allocation9], 0 }
   0xa   :  { %21 = vsyncpa [#allocation9 + $0x1], 0 }
   0xb   :  { %22 = vsyncpa [#allocation4], 0 }
   0xc   :  { %24 = vsyncpa [#allocation4 + $0x1], 0 }
   0xd   :  { %25 = vsyncpa [#allocation12], 0 }
   0xe   :  { %27 = vsyncpa [#allocation12 + $0x1], 0  ;;  %s1748_s24 = smov 0   ;;  %s1750_s25 = smov 0  }
   0xf   :  { %s1752_s26 = smov 0   ;;  %s1754_s27 = smov 0  }
  0x10   :  { %s1756_s28 = smov 0   ;;  %s1758_s29 = smov 0  }
  0x11 LB: > { %2202 = sst [smem:[#allocation18_spill]] %s1676_s24  ;;  %s1779_s30 = sadd.s32 4294967295, %s1696_s29   ;;  %s1696_s29 = sphi %s1758_s29, %s33_s29   ;;  %s1692_s28 = sphi %s1756_s28, %s2240_s28   ;;  %s1688_s27 = sphi %s1754_s27, %s2239_s27   ;;  %s1684_s26 = sphi %s1752_s26, %s2235_s26   ;;  %s1680_s25 = sphi %s1750_s25, %s2238_s25   ;;  %s1676_s24 = sphi %s1748_s24, %s2237_s24  }
  0x12   : > { %2203 = sst [smem:[#allocation19_spill]] %s1684_s26  ;;  %s1264_s8 = sadd.s32 4294967294, %s1696_s29  }
  0x13   : > { %2204 = sst [smem:[#allocation20_spill]] %s1696_s29  ;;  %s45_s9 = sadd.s32 1, %s1692_s28 }
  0x14   : > { %s52_s10 = sadd.s32 1, %s1684_s26  ;;  %p47_p0 = scmp.ge.s32.totalorder %s45_s9, 4 }
  0x15   : > { %p59_p1 = scmp.ne.s32.totalorder %s1684_s26, %s1680_s25  ;;  %p60_p2 = scmp.eq.s32.totalorder %s1696_s29, 0 }
  0x16   : > { %p65_p3 = scmp.ne.s32.totalorder %s1680_s25, %s1676_s24  ;;  %s2242_s9 = smov (%p47_p0, %s45_s9), 0 }
  0x17   : > { %2205 = sst [smem:[#allocation21_spill]] %s2242_s9  ;;  %p1791_p4 = por %p60_p2, %p59_p1 }
  0x18   : > { %p66_p5 = scmp.eq.s32.totalorder %s1779_s30, 0  ;;  %s49_s12 = ssub.s32 %s1692_s28, %s2242_s9 }
  0x19   : > { %p227_p6 = scmp.eq.s32.totalorder %s1779_s30, 3  ;;  %p50_p7 = scmp.eq.s32.totalorder %s49_s12, 0 }
  0x1a   : > { %p1799_p8 = por %p66_p5, %p65_p3  ;;  %p233_p10 = scmp.eq.s32.totalorder %s1264_s8, 3 }
  0x1b   : > { %p1803_p9 = por %p227_p6, %p59_p1  ;;  %p1400_p12 = scmp.lt.s32.totalorder %s1696_s29, 4 }
  0x1c   : > { %s2207_s13 = scalar_select %p1799_p8, 1, 0 }
  0x1d   : > { %s2208_s14 = scalar_select %p1803_p9, 1, 0 }
  0x1e   : > { %s1808_s15 = scalar_select %p50_p7, %s1684_s26, %s52_s10  }
  0x1f   : > { %p1810_p11 = por %p233_p10, %p65_p3  ;;  %s1816_s17 = sand.u32 1, %s1684_s26  }
  0x20   : > { %2209 = sst [smem:[#allocation22_spill]] %s1808_s15  ;;  %s2183_s18 = sshll.u32 %s1816_s17, 3 }
  0x21   : > { %s2210_s16 = scalar_select %p1810_p11, 1, 0 }
  0x22   : > { %s2184_s19 = sshll.u32 %s1692_s28, 7  ;;  %p1822_p13 = pnand %p1400_p12, %p1791_p4 }
  0x23   : > { %2211 = sst [smem:[#allocation23_spill]] %s2210_s16  ;;  %s300_s21 = sand.u32 1, %s1696_s29  }
  0x24   : > { %s2212_s20 = scalar_select %p1822_p13, 1, 0 }
  0x25   : > { %s2213_s1 = sld [smem:[#allocation25_spill]]  ;;  %s304_s10 = scalar_lea.vmem [#allocation5], %s2183_s18 }
  0x26   : > { %s311_s12 = sshll.u32 %s304_s10, 4  ;;  %s1840_s11 = scalar_lea.sflag [#allocation6], %s300_s21  ;;  %s1837_s12 = int_to_ptr.vmem [resolvable:$true] %s311_s12 }
  0x27   : > { %p1846_p3 = pneg %p1822_p13 }
  0x2b   : > { %s1832_s8 = scalar_lea.hbm %s2213_s1, %s2184_s19  ;;  %s1459_s10 = scalar_lea.hbm %s2213_s1, 512 }
  0x2c   : > { %s1454_s9 = scalar_lea.hbm %s1832_s8, 128  ;;  %p1460_p6 = scmp.lt.u32.totalorder %s1832_s8, %s2213_s1 }
  0x2d   : > { %p1455_p2 = scmp.ne.s32.totalorder %s1832_s8, %s1454_s9  ;;  %p1461_p7 = scmp.lt.u32.totalorder %s1459_s10, %s1454_s9 }
  0x2e   : > { %p1463_p12 = scmp.lt.u32.totalorder %s1454_s9, %s1832_s8 }
  0x2f   : > { %p1457_p4 = pnand %p1846_p3, %p1455_p2  ;;  %p1462_p10 = por %p1461_p7, %p1460_p6 }
  0x31   : > { %p1458_p5 = pneg %p1457_p4  ;;  %p1464_p0 = por %p1463_p12, %p1462_p10 }
  0x33   : > { %p1465_p1 = pnand %p1464_p0, %p1458_p5 }
  0x35   : > { %1468 = shalt.err (!%p1465_p1)
}
  0x36   : > { %s1469_s21 = scalar_lea.vmem %s1837_s12, 128  ;;  %s1698_s18 = smov [#allocation5]  }
  0x37   : > { %p1470_p2 = scmp.ne.s32.totalorder %s1837_s12, %s1469_s21  ;;  %s1474_s23 = sshll.u32 %s1698_s18, 4  ;;  %s1475_s23 = int_to_ptr.vmem [resolvable:$false] %s1474_s23 }
  0x38   : > { %s1476_s15 = scalar_lea.vmem %s1475_s23, 256  ;;  %p1477_p9 = scmp.lt.s32.totalorder %s1837_s12, %s1475_s23 }
  0x39   : > { %p1472_p4 = pnand %p1470_p2, %p1846_p3  ;;  %p1478_p8 = scmp.lt.s32.totalorder %s1476_s15, %s1469_s21 }
  0x3b   : > { %p1473_p11 = pneg %p1472_p4  ;;  %p1479_p6 = por %p1478_p8, %p1477_p9 }
  0x3d   : > { %p1480_p7 = pnand %p1479_p6, %p1473_p11 }
  0x3f   : > { %1483 = shalt.err (!%p1480_p7)
}
  0x40   : > { %s2189_s9 = smov 32   ;;  %s2190_s19 = smov 2  }
  0x41   : > { %1386 = dma.hbm_to_vmem [thread:$0]  (!%p1822_p13), %s1832_s8, 128, %s1837_s12, %s1840_s11, %s2189_s9, %s2189_s9, %s2190_s19  }
  0x42   : > { %p2215_p8 = scmp.lt.s32.totalorder %s1696_s29, 5  ;;  %p2216_p9 = scmp.ge.s32.totalorder %s1696_s29, 1 }
  0x43   : > { %s2218_s21 = sshll.u32 %s1692_s28, 7  ;;  %s2219_s0 = sld [smem:[#allocation24_spill]] }
  0x44   : > { %p1877_p11 = pnand %p2216_p9, %p2215_p8  ;;  %s2220_s1 = sshll.u32 %s1816_s17, 3 }
  0x45   : > { %s283_s26 = scalar_lea.vmem [#allocation2], %s2220_s1  ;;  %s1273_s8 = sshll.u32 %s1816_s17, 2 }
  0x46   : > { %s2217_s10 = scalar_select %p1877_p11, 1, 0 }
  0x47   : > { %s290_s16 = sshll.u32 %s283_s26, 4  ;;  %s280_s12 = scalar_lea.sflag [#allocation3], %s1816_s17  ;;  %s1891_s16 = int_to_ptr.vmem [resolvable:$true] %s290_s16 }
  0x49   : > { %s1886_s15 = scalar_lea.hbm %s2219_s0, %s2218_s21  ;;  %s1489_s21 = scalar_lea.hbm %s2219_s0, 512 }
  0x4a   : > { %s1484_s9 = scalar_lea.hbm %s1886_s15, 128  ;;  %p1490_p10 = scmp.lt.u32.totalorder %s1886_s15, %s2219_s0 }
  0x4b   : > { %p1485_p0 = scmp.ne.s32.totalorder %s1886_s15, %s1484_s9  ;;  %p1491_p12 = scmp.lt.u32.totalorder %s1489_s21, %s1484_s9 }
  0x4c   : > { %p1493_p4 = scmp.lt.u32.totalorder %s1484_s9, %s1886_s15 }
  0x4d   : > { %p1487_p1 = pnand %p1485_p0, %p1846_p3  ;;  %p1492_p2 = por %p1491_p12, %p1490_p10 }
  0x4f   : > { %p1488_p5 = pneg %p1487_p1  ;;  %p1494_p6 = por %p1493_p4, %p1492_p2 }
  0x51   : > { %p1495_p7 = pnand %p1494_p6, %p1488_p5 }
  0x53   : > { %1498 = shalt.err (!%p1495_p7)
}
  0x54   : > { %s1499_s1 = scalar_lea.vmem %s1891_s16, 128  ;;  %s1701_s26 = smov [#allocation2]  }
  0x55   : > { %p1500_p8 = scmp.ne.s32.totalorder %s1891_s16, %s1499_s1  ;;  %s1504_s19 = sshll.u32 %s1701_s26, 4  ;;  %s1505_s19 = int_to_ptr.vmem [resolvable:$false] %s1504_s19 }
  0x56   : > { %s1506_s24 = scalar_lea.vmem %s1505_s19, 256  ;;  %p1507_p1 = scmp.lt.s32.totalorder %s1891_s16, %s1505_s19 }
  0x57   : > { %p1502_p9 = pnand %p1500_p8, %p1846_p3  ;;  %p1508_p11 = scmp.lt.s32.totalorder %s1506_s24, %s1499_s1 }
  0x59   : > { %p1503_p0 = pneg %p1502_p9  ;;  %p1509_p10 = por %p1508_p11, %p1507_p1 }
  0x5b   : > { %p1510_p12 = pnand %p1509_p10, %p1503_p0 }
  0x5d   : > { %1513 = shalt.err (!%p1510_p12)
}
  0x5e   : > { %s2221_s9 = smov 2   ;;  %s2222_s18 = smov 32  }
  0x5f   : > { %1383 = dma.hbm_to_vmem [thread:$0]  (!%p1822_p13), %s1886_s15, 128, %s1891_s16, %s280_s12, %s2222_s18, %s2222_s18, %s2221_s9  }
  0x60   : > { %s1274_s21 = sshll.u32 %s1692_s28, 6  ;;  %s325_s23 = scalar_lea.vmem [#allocation7], %s1273_s8 }
  0x61   : > { %s333_s1 = sshll.u32 %s325_s23, 4  ;;  %s331_s24 = scalar_lea.hbm %s2176_s2, %s1274_s21  ;;  %s334_s1 = int_to_ptr.vmem [resolvable:$true] %s333_s1 }
  0x62   : > { %s1514_s0 = scalar_lea.hbm %s331_s24, 64  ;;  %s1519_s6 = scalar_lea.hbm %s2176_s2, 256 }
  0x63   : > { %p1515_p11 = scmp.ne.s32.totalorder %s331_s24, %s1514_s0  ;;  %p1520_p4 = scmp.lt.u32.totalorder %s331_s24, %s2176_s2 }
  0x64   : > { %p1521_p6 = scmp.lt.u32.totalorder %s1519_s6, %s1514_s0  ;;  %p1523_p8 = scmp.lt.u32.totalorder %s1514_s0, %s331_s24 }
  0x65   : > { %p1517_p5 = pnand %p1515_p11, %p1846_p3 }
  0x66   : > { %p1522_p7 = por %p1521_p6, %p1520_p4 }
  0x67   : > { %p1518_p2 = pneg %p1517_p5 }
  0x68   : > { %p1524_p9 = por %p1523_p8, %p1522_p7 }
  0x6a   : > { %p1525_p0 = pnand %p1524_p9, %p1518_p2 }
  0x6c   : > { %1528 = shalt.err (!%p1525_p0)
}
  0x6d   : > { %s1529_s12 = scalar_lea.vmem %s334_s1, 64  ;;  %s1702_s9 = smov [#allocation7]  }
  0x6e   : > { %p1530_p1 = scmp.ne.s32.totalorder %s334_s1, %s1529_s12  ;;  %s1534_s18 = sshll.u32 %s1702_s9, 4  ;;  %s1535_s18 = int_to_ptr.vmem [resolvable:$false] %s1534_s18 }
  0x6f   : > { %s1536_s7 = scalar_lea.vmem %s1535_s18, 128  ;;  %p1537_p11 = scmp.lt.s32.totalorder %s334_s1, %s1535_s18 }
  0x70   : > { %p1532_p10 = pnand %p1530_p1, %p1846_p3  ;;  %p1538_p5 = scmp.lt.s32.totalorder %s1536_s7, %s1529_s12 }
  0x72   : > { %p1533_p12 = pneg %p1532_p10  ;;  %p1539_p13 = por %p1538_p5, %p1537_p11 }
  0x74   : > { %p1540_p4 = pnand %p1539_p13, %p1533_p12 }
  0x76   : > { %1543 = shalt.err (!%p1540_p4)
}
  0x77   : > { %p2223_p6 = scmp.ne.s32.totalorder %s2212_s20, 0  ;;  %s1946_s29 = scalar_lea.hbm %s2177_s3, %s1274_s21 }
  0x78   : > { %s344_s23 = scalar_lea.vmem [#allocation8], %s1273_s8  ;;  %s341_s19 = scalar_lea.sflag [#allocation9], %s1816_s17 }
  0x79   : > { %1389 = dma.hbm_to_vmem [thread:$0]  (!%p2223_p6), %s331_s24, 64, %s334_s1, %s1840_s11  }
  0x7a   : > { %s352_s26 = sshll.u32 %s344_s23, 4  ;;  %s1544_s16 = scalar_lea.hbm %s1946_s29, 64  ;;  %s353_s26 = int_to_ptr.vmem [resolvable:$true] %s352_s26 }
  0x7b   : > { %p1545_p13 = scmp.ne.s32.totalorder %s1946_s29, %s1544_s16  ;;  %s1549_s24 = scalar_lea.hbm %s2177_s3, 256 }
  0x7c   : > { %p1550_p8 = scmp.lt.u32.totalorder %s1946_s29, %s2177_s3  ;;  %p1551_p9 = scmp.lt.u32.totalorder %s1549_s24, %s1544_s16 }
  0x7d   : > { %p1547_p2 = pnand %p1545_p13, %p1846_p3  ;;  %p1553_p1 = scmp.lt.u32.totalorder %s1544_s16, %s1946_s29 }
  0x7e   : > { %p1552_p0 = por %p1551_p9, %p1550_p8 }
  0x7f   : > { %p1548_p7 = pneg %p1547_p2 }
  0x80   : > { %p1554_p10 = por %p1553_p1, %p1552_p0 }
  0x82   : > { %p1555_p12 = pnand %p1554_p10, %p1548_p7 }
  0x84   : > { %1558 = shalt.err (!%p1555_p12)
}
  0x85   : > { %s1559_s17 = scalar_lea.vmem %s353_s26, 64  ;;  %s1703_s8 = smov [#allocation8]  }
  0x86   : > { %p1560_p11 = scmp.ne.s32.totalorder %s353_s26, %s1559_s17  ;;  %s1564_s12 = sshll.u32 %s1703_s8, 4  ;;  %s1565_s12 = int_to_ptr.vmem [resolvable:$false] %s1564_s12 }
  0x87   : > { %s1566_s9 = scalar_lea.vmem %s1565_s12, 128  ;;  %p1567_p13 = scmp.lt.s32.totalorder %s353_s26, %s1565_s12 }
  0x88   : > { %p1562_p5 = pnand %p1560_p11, %p1846_p3  ;;  %p1568_p2 = scmp.lt.s32.totalorder %s1566_s9, %s1559_s17 }
  0x8a   : > { %p1563_p4 = pneg %p1562_p5  ;;  %p1569_p6 = por %p1568_p2, %p1567_p13 }
  0x8c   : > { %p1570_p8 = pnand %p1569_p6, %p1563_p4 }
  0x8e   : > { %1573 = shalt.err (!%p1570_p8)
}
  0x8f   : > { %p2224_p9 = scmp.ne.s32.totalorder %s2212_s20, 0  ;;  %p2225_p7 = scmp.ne.s32.totalorder %s2217_s10, 0 }
  0x90   : > { %s1971_s22 = sand.u32 (!%p2225_p7), 1, %s1680_s25   ;;  %p2226_p3 = scmp.ne.s32.totalorder (!%p2225_p7), %s2207_s13, 0 }
  0x91   : > { %1392 = dma.hbm_to_vmem [thread:$0]  (!%p2224_p9), %s1946_s29, 64, %s353_s26, %s341_s19  }
  0x92   : > { %381 = sbr.rel (%p2225_p7) target bundleno = 481 (0x1e1), region = 44  ;;  %s1278_s18 = sshll.u32 (!%p2225_p7), %s1971_s22, 3 }
  0x93   : > { %s384_s7 = scalar_lea.sflag (!%p2225_p7), [#allocation3], %s1971_s22  ;;  %s1975_s0 = scalar_lea.vmem (!%p2225_p7), [#allocation2], %s1278_s18 }
  0x99   : > { %1655 = dma.done.wait (%p2226_p3), %s384_s7, 128  }
  0x9a   : > { %1657 = vsyncadd (%p2226_p3), %s384_s7, 4294967168  ;;  %s392_s20 = sand.u32 1, %s1779_s30   ;;  %s1982_s6 = scalar_lea.vmem [#allocation5], %s1278_s18 }
  0x9b   : > { %s393_s10 = scalar_lea.sflag [#allocation6], %s392_s20 }
  0x9c   : > { %1659 = dma.done.wait (%p2226_p3), %s393_s10, 192  }
  0x9d   : > { %1661 = vsyncadd (%p2226_p3), %s393_s10, 4294967104  ;;  %s1280_s29 = sshll.u32 %s1971_s22, 2  ;;  %s411_s26 = scalar_lea.sflag [#allocation9], %s1971_s22 }
  0x9e   : > { %s1989_s23 = scalar_lea.vmem [#allocation7], %s1280_s29  ;;  %s1992_s19 = scalar_lea.vmem [#allocation8], %s1280_s29 }
  0x9f   : > { %1663 = dma.done.wait (%p2226_p3), %s411_s26, 64  }
  0xa0   : > { %1665 = vsyncadd (%p2226_p3), %s411_s26, 4294967232  ;;  %p477_p6 = scmp.lt.s32.totalorder %s1688_s27, 3  ;;  %v498_v0 = vlaneseq  ;;  %v1704_v1 = vmov 0.0   ;;  %vm1705_vm0 = vmmov 0   ;;  %vm538_vm1 = vcmask 1041408   ;;  %s2062_s17 = scalar_lea.vmem [#allocation10], %s1971_s22 }
  0xa1   : > { %1320 = vmatprep.subr.bf16.mxu0 %v1704_v1  ;;  %1326 = vmatprep.subr.bf16.mxu1 %v1704_v1  ;;  %v533_v30 = vld [vmem:[%s1975_s0] sm:$0x3]  ;;  %vm534_vm2 = vcmask 31744   ;;  %v1285_v31 = vld [vmem:[%s1975_s0 + $0x2] sm:$0x3]  ;;  %496 = vst [vmem:[%s2062_s17] sm:$0x1] %v1704_v1 }
  0xa2   : > { %s478_s30 = scalar_select %p477_p6, %s1688_s27, 3  ;;  %v502_v2 = vand.u32 127, %v498_v0  ;;  %1322 = vmatprep.mubr.msk.bf16.mxu0 %vm1705_vm0, %v1704_v1  ;;  %1328 = vmatprep.mubr.msk.bf16.mxu1 %vm1705_vm0, %v1704_v1  ;;  %v2009_v4 = vshrl.u32 %v498_v0, 7  ;;  %v1287_v34 = vld [vmem:[%s1975_s0 + $0x4] sm:$0x3]  ;;  %vm583_vm3 = vcmask 1043456  }
  0xa3   : > { %v1289_v35 = vld [vmem:[%s1975_s0 + $0x6] sm:$0x3]  ;;  %v795_v37 = vld [vmem:[%s1982_s6] sm:$0x3]  ;;  %v1292_v38 = vld [vmem:[%s1982_s6 + $0x2] sm:$0x3] }
  0xa4   : > { %s1282_s13 = sshll.u32 %s478_s30, 1  ;;  %v506_v3 = vcvt.s32.f32 %v502_v2  ;;  %v525_v7 = vsub.s32 1, %v2009_v4  ;;  %v517_v14 = vsub.s32 0, %v2009_v4  ;;  %v2019_v16 = vcvt.s32.f32 %v2009_v4  ;;  %v1294_v39 = vld [vmem:[%s1982_s6 + $0x4] sm:$0x3]  ;;  %s2067_s8 = scalar_lea.vmem [#allocation11], %s1971_s22 }
  0xa5   : > { %s483_s1 = scalar_lea.vmem %s2178_s4, %s1282_s13  ;;  %s490_s15 = scalar_lea.vmem %s2179_s5, %s1282_s13  ;;  %v1296_v40 = vld [vmem:[%s1982_s6 + $0x6] sm:$0x3]  ;;  %497 = vst [vmem:[%s2067_s8] sm:$0x1] %v1704_v1 }
  0xa6   : > { %v508_v5 = vmul.f32 0.25, %v506_v3  ;;  %v512_v8 = vld [vmem:[%s483_s1] sm:$0x3]  ;;  %s1298_s12 = sshll.u32 %s1688_s27, 4  ;;  %s1050_s9 = sshll.u32 %s2062_s17, 4  ;;  %s2093_s9 = int_to_ptr.vmem [resolvable:$true] %s1050_s9 }
  0xa7   : > { %v774_v9 = vld [vmem:[%s490_s15] sm:$0x3]  ;;  %s2227_s0 = sld [smem:[#allocation26_spill]]  ;;  %s1034_s10 = scalar_lea.sflag [#allocation4], %s1971_s22 }
  0xa8   : > { %v509_v6 = vfloor.f32 %v508_v5  ;;  %s1574_s6 = scalar_lea.vmem %s2093_s9, 16  ;;  %p2228_p1 = scmp.ne.s32.totalorder %s2208_s14, 0 }
  0xa9   : > { %p1575_p0 = scmp.ne.s32.totalorder %s2093_s9, %s1574_s6  ;;  %s1706_s29 = smov [#allocation10]  }
  0xaa   : > { %v510_v10 = vmul.f32 4.0, %v509_v6  ;;  %v514_v11 = vadd.f32 %v512_v8, %v509_v6  ;;  %v776_v12 = vadd.f32 %v774_v9, %v509_v6 }
  0xab   : > { %p1576_p10 = pnand %p1575_p0, %p2228_p1 }
  0xac   : > { %v511_v13 = vsub.f32 %v506_v3, %v510_v10  ;;  %v526_v15 = vrot.slane %v514_v11, %v525_v7  ;;  %v788_v41 = vrot.slane %v776_v12, %v525_v7 }
  0xad   : > { %s2091_s20 = scalar_lea.hbm %s2227_s0, %s1298_s12  ;;  %p1577_p12 = pneg %p1576_p10 }
  0xae   : > { %v513_v17 = vadd.f32 %v512_v8, %v511_v13  ;;  %v775_v18 = vadd.f32 %v774_v9, %v511_v13  ;;  %v527_v42 = vsub.f32 %v2019_v16, %v526_v15  ;;  %v789_v52 = vsub.f32 %v2019_v16, %v788_v41 }
  0xb0   : > { %v518_v19 = vrot.slane %v513_v17, %v517_v14  ;;  %v780_v20 = vrot.slane %v775_v18, %v517_v14  ;;  %v528_v43 = vand.u32 2147483647, %v527_v42  ;;  %v790_v61 = vand.u32 2147483647, %v789_v52 }
  0xb2   : > { %v519_v21 = vsub.f32 %v2019_v16, %v518_v19  ;;  %v781_v22 = vsub.f32 %v2019_v16, %v780_v20  ;;  %v529_v44 = vsub.f32 1.0, %v528_v43  ;;  %v791_v8 = vsub.f32 1.0, %v790_v61 }
  0xb4   : > { %v520_v23 = vand.u32 2147483647, %v519_v21  ;;  %v782_v25 = vand.u32 2147483647, %v781_v22  ;;  %v530_v45 = vmax.f32 %v529_v44, 0.0  ;;  %v792_v22 = vmax.f32 %v791_v8, 0.0 }
  0xb5   : > { %v532_v21 = vld [vmem:[%s1992_s19] sm:$0xf] }
  0xb6   : > { %v521_v24 = vsub.f32 1.0, %v520_v23  ;;  %v783_v28 = vsub.f32 1.0, %v782_v25 }
  0xb8   : > { %v522_v26 = vmax.f32 %v521_v24, 0.0  ;;  %v784_v32 = vmax.f32 %v783_v28, 0.0 }
  0xba   : > { %v531_v27 = vpack.c.bf16 %v522_v26, %v522_v26  ;;  %v793_v33 = vpack.c.bf16 %v784_v32, %v784_v32 }
  0xbc   : > { %v540_v29 = vsel %vm538_vm1, %v531_v27, 0  ;;  %v800_v36 = vsel %vm538_vm1, %v793_v33, 0 }
  0xbd   : > { %1321 = vmatpush3.bf16.msra.mxu0 %v540_v29  ;;  %1327 = vmatpush3.bf16.msra.mxu1 %v540_v29 }
  0xbe   : > { %1332 = vmatprep.subr.bf16.mxu0 %v1704_v1  ;;  %1338 = vmatprep.subr.bf16.mxu1 %v1704_v1 }
  0xc0   : > { %1323 = vmatmul.mubr.msk.bf16.vlgmr.msra.gmra.mrb[0].mxu0 %vm534_vm2, %v533_v30  ;;  %1329 = vmatmul.mubr.msk.bf16.vlgmr.msra.gmra.mrb[0].mxu1 %vm534_vm2, %v1285_v31 }
  0xc1   : > { %1333 = vmatpush3.bf16.msra.mxu0 %v540_v29  ;;  %1339 = vmatpush3.bf16.msra.mxu1 %v540_v29 }
  0xc2   : > { %1334 = vmatprep.mubr.msk.bf16.mxu0 %vm1705_vm0, %v1704_v1  ;;  %1340 = vmatprep.mubr.msk.bf16.mxu1 %vm1705_vm0, %v1704_v1 }
  0xc3   : > { %1344 = vmatprep.subr.bf16.mxu0 %v1704_v1  ;;  %1350 = vmatprep.subr.bf16.mxu1 %v1704_v1 }
  0xc8   : > { %1335 = vmatmul.mubr.msk.bf16.vlgmr.msra.gmra.mrb[4].mxu0 %vm534_vm2, %v1287_v34  ;;  %1341 = vmatmul.mubr.msk.bf16.vlgmr.msra.gmra.mrb[4].mxu1 %vm534_vm2, %v1289_v35 }
  0xc9   : > { %1345 = vmatpush3.bf16.msra.mxu0 %v800_v36  ;;  %1351 = vmatpush3.bf16.msra.mxu1 %v800_v36 }
  0xca   : > { %1346 = vmatprep.mubr.msk.bf16.mxu0 %vm1705_vm0, %v1704_v1  ;;  %1352 = vmatprep.mubr.msk.bf16.mxu1 %vm1705_vm0, %v1704_v1 }
  0xcb   : > { %1356 = vmatprep.subr.bf16.mxu0 %v1704_v1  ;;  %1362 = vmatprep.subr.bf16.mxu1 %v1704_v1 }
  0xd0   : > { %1347 = vmatmul.mubr.msk.bf16.vlgmr.msra.gmra.mrb[8].mxu0 %vm534_vm2, %v795_v37  ;;  %1353 = vmatmul.mubr.msk.bf16.vlgmr.msra.gmra.mrb[8].mxu1 %vm534_vm2, %v1292_v38 }
  0xd1   : > { %1357 = vmatpush3.bf16.msra.mxu0 %v800_v36  ;;  %1363 = vmatpush3.bf16.msra.mxu1 %v800_v36 }
  0xd2   : > { %1358 = vmatprep.mubr.msk.bf16.mxu0 %vm1705_vm0, %v1704_v1  ;;  %1364 = vmatprep.mubr.msk.bf16.mxu1 %vm1705_vm0, %v1704_v1 }
  0xd8   : > { %1359 = vmatmul.mubr.msk.bf16.vlgmr.msra.gmra.mrb[12].mxu0 %vm534_vm2, %v1294_v39  ;;  %1365 = vmatmul.mubr.msk.bf16.vlgmr.msra.gmra.mrb[12].mxu1 %vm534_vm2, %v1296_v40 }
 0x193   : > { %v576_v46 = vpop.f32.mrb[0].mxu0  ;;  %v633_v47 = vpop.f32.mrb[0].mxu1 }
 0x194   : > { %v582_v48 = vmul.f32 %v576_v46, %v530_v45  ;;  %v639_v49 = vmul.f32 %v633_v47, %v530_v45  ;;  %v1324_v50 = vpop.f32.mrb[1].mxu0  ;;  %v1330_v51 = vpop.f32.mrb[1].mxu1 }
 0x195   : > { %v579_v53 = vpop.f32.mrb[2].mxu0  ;;  %v636_v54 = vpop.f32.mrb[2].mxu1 }
 0x196   : > { %v584_v55 = vsel %vm583_vm3, %v582_v48, 0.0  ;;  %v640_v56 = vsel %vm583_vm3, %v639_v49, 0.0  ;;  %v1325_v57 = vpop.f32.mrb[3].mxu0  ;;  %v1331_v58 = vpop.f32.mrb[3].mxu1 }
 0x197   : > { %v585_v59 = vrot.slane %v584_v55, 4  ;;  %v641_v60 = vrot.slane %v640_v56, 4 }
 0x199   : > { %v586_v62 = vadd.f32 %v585_v59, %v584_v55  ;;  %v642_v63 = vadd.f32 %v641_v60, %v640_v56 }
 0x19b   : > { %v587_v0 = vrot.slane %v586_v62, 2  ;;  %v643_v1 = vrot.slane %v642_v63, 2  ;;  %v692_v2 = vpop.f32.mrb[4].mxu0  ;;  %v751_v3 = vpop.f32.mrb[4].mxu1 }
 0x19c   : > { %v698_v4 = vmul.f32 %v692_v2, %v530_v45  ;;  %v757_v5 = vmul.f32 %v751_v3, %v530_v45  ;;  %v1336_v6 = vpop.f32.mrb[5].mxu0  ;;  %v1342_v7 = vpop.f32.mrb[5].mxu1 }
 0x19d   : > { %v588_v9 = vadd.f32 %v587_v0, %v586_v62  ;;  %v644_v10 = vadd.f32 %v643_v1, %v642_v63  ;;  %v695_v11 = vpop.f32.mrb[6].mxu0  ;;  %v754_v12 = vpop.f32.mrb[6].mxu1 }
 0x19e   : > { %v699_v13 = vsel %vm583_vm3, %v698_v4, 0.0  ;;  %v758_v14 = vsel %vm583_vm3, %v757_v5, 0.0  ;;  %v1337_v15 = vpop.f32.mrb[7].mxu0  ;;  %v1343_v16 = vpop.f32.mrb[7].mxu1 }
 0x19f   : > { %v589_v17 = vrot.slane %v588_v9, 1  ;;  %v645_v18 = vrot.slane %v644_v10, 1  ;;  %v700_v19 = vrot.slane %v699_v13, 4  ;;  %v759_v20 = vrot.slane %v758_v14, 4 }
 0x1a1   : > { %v590_v23 = vadd.f32 %v589_v17, %v588_v9  ;;  %v646_v24 = vadd.f32 %v645_v18, %v644_v10  ;;  %v701_v25 = vadd.f32 %v700_v19, %v699_v13  ;;  %v760_v26 = vadd.f32 %v759_v20, %v758_v14  ;;  %v794_v20 = vld [vmem:[%s1989_s23] sm:$0xf]  ;;  %s1578_s23 = sshll.u32 %s1706_s29, 4  ;;  %s1579_s23 = int_to_ptr.vmem [resolvable:$false] %s1578_s23 }
 0x1a2   : > { %s1580_s26 = scalar_lea.vmem %s1579_s23, 32  ;;  %p1581_p11 = scmp.lt.s32.totalorder %s2093_s9, %s1579_s23 }
 0x1a3   : > { %v591_v27 = vsub.f32 %v590_v23, %v532_v21  ;;  %v647_v28 = vsub.f32 %v646_v24, %v532_v21  ;;  %v702_v29 = vrot.slane %v701_v25, 2  ;;  %v761_v30 = vrot.slane %v760_v26, 2  ;;  %v836_v31 = vpop.f32.mrb[8].mxu0  ;;  %v892_v32 = vpop.f32.mrb[8].mxu1  ;;  %p1582_p5 = scmp.lt.s32.totalorder %s1580_s26, %s1574_s6 }
 0x1a4   : > { %v842_v33 = vmul.f32 %v836_v31, %v792_v22  ;;  %v898_v34 = vmul.f32 %v892_v32, %v792_v22  ;;  %v1348_v35 = vpop.f32.mrb[9].mxu0  ;;  %v1354_v36 = vpop.f32.mrb[9].mxu1 }
 0x1a5   : > { %v648_v37 = vand.u32 2147483647, %v647_v28  ;;  %v703_v38 = vadd.f32 %v702_v29, %v701_v25  ;;  %v762_v39 = vadd.f32 %v761_v30, %v760_v26  ;;  %v839_v40 = vpop.f32.mrb[10].mxu0  ;;  %v895_v41 = vpop.f32.mrb[10].mxu1  ;;  %v592_v42 = vand.u32 2147483647, %v591_v27  ;;  %p1583_p4 = por %p1582_p5, %p1581_p11 }
 0x1a6   : > { %v843_v43 = vsel %vm583_vm3, %v842_v33, 0.0  ;;  %v899_v44 = vsel %vm583_vm3, %v898_v34, 0.0  ;;  %v1349_v45 = vpop.f32.mrb[11].mxu0  ;;  %v1355_v46 = vpop.f32.mrb[11].mxu1  ;;  %v771_v25 = vld [vmem:[%s2062_s17] sm:$0x1] }
 0x1a7   : > { %v650_v47 = vrot.slane %v648_v37, 1  ;;  %v704_v48 = vrot.slane %v703_v38, 1  ;;  %v763_v49 = vrot.slane %v762_v39, 1  ;;  %v844_v50 = vrot.slane %v843_v43, 4  ;;  %p1584_p13 = pnand %p1583_p4, %p1577_p12 }
 0x1a8   : > { %v900_v51 = vrot.slane %v899_v44, 4 }
 0x1a9   : > { %v652_v52 = vadd.f32 %v650_v47, %v592_v42  ;;  %v705_v53 = vadd.f32 %v704_v48, %v703_v38  ;;  %v764_v54 = vadd.f32 %v763_v49, %v762_v39  ;;  %v845_v55 = vadd.f32 %v844_v50, %v843_v43 }
 0x1aa   : > { %v901_v56 = vadd.f32 %v900_v51, %v899_v44 }
 0x1ab   : > { %v706_v57 = vsub.f32 %v705_v53, %v532_v21  ;;  %v765_v58 = vsub.f32 %v764_v54, %v532_v21  ;;  %v846_v59 = vrot.slane %v845_v55, 2  ;;  %v951_v60 = vpop.f32.mrb[12].mxu0  ;;  %v1010_v61 = vpop.f32.mrb[12].mxu1 }
 0x1ac   : > { %v902_v62 = vrot.slane %v901_v56, 2  ;;  %v957_v63 = vmul.f32 %v951_v60, %v792_v22  ;;  %v1016_v0 = vmul.f32 %v1010_v61, %v792_v22  ;;  %v1360_v1 = vpop.f32.mrb[13].mxu0  ;;  %v1366_v2 = vpop.f32.mrb[13].mxu1 }
 0x1ad   : > { %v707_v3 = vand.u32 2147483647, %v706_v57  ;;  %v766_v4 = vand.u32 2147483647, %v765_v58  ;;  %v847_v5 = vadd.f32 %v846_v59, %v845_v55  ;;  %v954_v6 = vpop.f32.mrb[14].mxu0  ;;  %v1013_v7 = vpop.f32.mrb[14].mxu1 }
 0x1ae   : > { %v903_v8 = vadd.f32 %v902_v62, %v901_v56  ;;  %v958_v9 = vsel %vm583_vm3, %v957_v63, 0.0  ;;  %v1017_v10 = vsel %vm583_vm3, %v1016_v0, 0.0  ;;  %v1361_v11 = vpop.f32.mrb[15].mxu0  ;;  %v1367_v12 = vpop.f32.mrb[15].mxu1 }
 0x1af   : > { %v709_v13 = vrot.slane %v707_v3, 2  ;;  %v848_v14 = vrot.slane %v847_v5, 1  ;;  %v959_v15 = vrot.slane %v958_v9, 4  ;;  %v1018_v17 = vrot.slane %v1017_v10, 4 }
 0x1b0   : > { %v904_v16 = vrot.slane %v903_v8, 1  ;;  %v768_v19 = vrot.slane %v766_v4, 3 }
 0x1b1   : > { %v711_v18 = vadd.f32 %v709_v13, %v652_v52  ;;  %v849_v21 = vadd.f32 %v848_v14, %v847_v5  ;;  %v960_v22 = vadd.f32 %v959_v15, %v958_v9  ;;  %v1019_v24 = vadd.f32 %v1018_v17, %v1017_v10 }
 0x1b2   : > { %v905_v23 = vadd.f32 %v904_v16, %v903_v8 }
 0x1b3   : > { %v770_v26 = vadd.f32 %v768_v19, %v711_v18  ;;  %v961_v27 = vrot.slane %v960_v22, 2  ;;  %v850_v28 = vsub.f32 %v849_v21, %v794_v20  ;;  %v1020_v30 = vrot.slane %v1019_v24, 2 }
 0x1b4   : > { %v906_v29 = vsub.f32 %v905_v23, %v794_v20 }
 0x1b5   : > { %v962_v31 = vadd.f32 %v961_v27, %v960_v22  ;;  %v772_v32 = vadd.f32 %v771_v25, %v770_v26  ;;  %v1021_v34 = vadd.f32 %v1020_v30, %v1019_v24  ;;  %v851_v36 = vand.u32 2147483647, %v850_v28 }
 0x1b6   : > { %v907_v33 = vand.u32 2147483647, %v906_v29 }
 0x1b7   : > { %v963_v35 = vrot.slane %v962_v31, 1  ;;  %773 = vst [vmem:[%s2062_s17] sm:$0x1] %v772_v32  ;;  %v1022_v38 = vrot.slane %v1021_v34, 1 }
 0x1b8   : > { %v909_v37 = vrot.slane %v907_v33, 1 }
 0x1b9   : > { %1587 = shalt.err (!%p1584_p13)
}
 0x1ba   : > { %s1588_s19 = scalar_lea.hbm %s2091_s20, 16  ;;  %s1592_s16 = scalar_lea.hbm %s2227_s0, 64 }
 0x1bb   : > { %p1589_p2 = scmp.ne.s32.totalorder %s2091_s20, %s1588_s19  ;;  %p1593_p7 = scmp.lt.u32.totalorder %s2091_s20, %s2227_s0 }
 0x1bc   : > { %p1594_p3 = scmp.lt.u32.totalorder %s1592_s16, %s1588_s19  ;;  %p1596_p0 = scmp.lt.u32.totalorder %s1588_s19, %s2091_s20 }
 0x1bd   : > { %p1590_p8 = pnand %p1589_p2, %p2228_p1 }
 0x1be   : > { %p1595_p6 = por %p1594_p3, %p1593_p7 }
 0x1bf   : > { %p1591_p9 = pneg %p1590_p8 }
 0x1c0   : > { %p1597_p10 = por %p1596_p0, %p1595_p6 }
 0x1c2   : > { %p1598_p12 = pnand %p1597_p10, %p1591_p9 }
 0x1c4   : > { %1601 = shalt.err (!%p1598_p12)
}
 0x1c5   : > { %1376 = dma.vmem_to_hbm [thread:$0]  (%p2228_p1), %s2093_s9, 16, %s2091_s20, %s1034_s10   ;;  %v964_v39 = vadd.f32 %v963_v35, %v962_v31  ;;  %v911_v40 = vadd.f32 %v909_v37, %v851_v36  ;;  %v1023_v41 = vadd.f32 %v1022_v38, %v1021_v34  ;;  %v1030_v49 = vld [vmem:[%s2067_s8] sm:$0x1] }
 0x1c6   : > { %s1063_s24 = sshll.u32 %s2067_s8, 4  ;;  %s2229_s17 = sld [smem:[#allocation27_spill]]  ;;  %s2127_s24 = int_to_ptr.vmem [resolvable:$true] %s1063_s24 }
 0x1c7   : > { %v965_v42 = vsub.f32 %v964_v39, %v794_v20  ;;  %v1024_v43 = vsub.f32 %v1023_v41, %v794_v20  ;;  %s1038_s18 = scalar_lea.sflag [#allocation12], %s1971_s22  ;;  %s1602_s7 = scalar_lea.vmem %s2127_s24, 16 }
 0x1c8   : > { %p1603_p11 = scmp.ne.s32.totalorder %s2127_s24, %s1602_s7  ;;  %s1707_s20 = smov [#allocation11]  }
 0x1c9   : > { %v966_v44 = vand.u32 2147483647, %v965_v42  ;;  %v1025_v45 = vand.u32 2147483647, %v1024_v43  ;;  %s1606_s10 = sshll.u32 %s1707_s20, 4  ;;  %s1607_s10 = int_to_ptr.vmem [resolvable:$false] %s1606_s10 }
 0x1ca   : > { %p1604_p5 = pnand %p1603_p11, %p2228_p1  ;;  %s1608_s27 = scalar_lea.vmem %s1607_s10, 32 }
 0x1cb   : > { %v968_v46 = vrot.slane %v966_v44, 2  ;;  %v1027_v48 = vrot.slane %v1025_v45, 3  ;;  %p1609_p13 = scmp.lt.s32.totalorder %s2127_s24, %s1607_s10  ;;  %p1610_p2 = scmp.lt.s32.totalorder %s1608_s27, %s1602_s7 }
 0x1cc   : > { %s2125_s9 = scalar_lea.hbm %s2229_s17, %s1298_s12  ;;  %p1605_p4 = pneg %p1604_p5 }
 0x1cd   : > { %v970_v47 = vadd.f32 %v968_v46, %v911_v40  ;;  %p1611_p8 = por %p1610_p2, %p1609_p13 }
 0x1cf   : > { %v1029_v50 = vadd.f32 %v1027_v48, %v970_v47  ;;  %p1612_p9 = pnand %p1611_p8, %p1605_p4 }
 0x1d1   : > { %v1031_v51 = vadd.f32 %v1030_v49, %v1029_v50 }
 0x1d3   : > { %1032 = vst [vmem:[%s2067_s8] sm:$0x1] %v1031_v51 }
 0x1d4   : > { %1615 = shalt.err (!%p1612_p9)
}
 0x1d5   : > { %s1616_s22 = scalar_lea.hbm %s2125_s9, 16  ;;  %s1620_s6 = scalar_lea.hbm %s2229_s17, 64 }
 0x1d6   : > { %p1617_p7 = scmp.ne.s32.totalorder %s2125_s9, %s1616_s22  ;;  %p1621_p0 = scmp.lt.u32.totalorder %s2125_s9, %s2229_s17 }
 0x1d7   : > { %p1622_p10 = scmp.lt.u32.totalorder %s1620_s6, %s1616_s22  ;;  %p1624_p11 = scmp.lt.u32.totalorder %s1616_s22, %s2125_s9 }
 0x1d8   : > { %p1618_p3 = pnand %p1617_p7, %p2228_p1 }
 0x1d9   : > { %p1623_p12 = por %p1622_p10, %p1621_p0 }
 0x1da   : > { %p1619_p6 = pneg %p1618_p3 }
 0x1db   : > { %p1625_p5 = por %p1624_p11, %p1623_p12 }
 0x1dd   : > { %p1626_p4 = pnand %p1625_p5, %p1619_p6 }
 0x1df   : > { %1629 = shalt.err (!%p1626_p4)
}
 0x1e0   : > { %1377 = dma.vmem_to_hbm [thread:$0]  (%p2228_p1), %s2127_s24, 16, %s2125_s9, %s1038_s18  }
 0x1e1 PF: > { %s2230_s26 = sld [smem:[#allocation20_spill]]  ;;  %s2231_s19 = sld [smem:[#allocation18_spill]] }
 0x1e2   : > { %s2232_s30 = sld [smem:[#allocation23_spill]] }
 0x1e7   : > { %p1401_p13 = scmp.ge.s32.totalorder %s2230_s26, 2  ;;  %s1075_s13 = sand.u32 1, %s2231_s19  }
 0x1e8   : > { %p2233_p2 = scmp.ne.s32.totalorder %s2232_s30, 0  ;;  %s1076_s16 = scalar_lea.sflag [#allocation4], %s1075_s13 }
 0x1ea   : > { %p1394_p8 = pnand %p1401_p13, %p2233_p2 }
 0x1ec   : > { %1667 = dma.done.wait (!%p1394_p8), %s1076_s16, 16  }
 0x1ed   : > { %1669 = vsyncadd (!%p1394_p8), %s1076_s16, 4294967280  ;;  %s1084_s11 = scalar_lea.sflag [#allocation12], %s1075_s13 }
 0x1ee   : > { %1671 = dma.done.wait (!%p1394_p8), %s1084_s11, 16  }
 0x1ef   : > { %1673 = vsyncadd (!%p1394_p8), %s1084_s11, 4294967280  ;;  %s33_s29 = sadd.s32 1, %s2230_s26   ;;  %s2234_s14 = sld [smem:[#allocation19_spill]] }
 0x1f0   : > { %p30_p9 = scmp.ge.s32.totalorder %s33_s29, 6   ;;  %s2235_s26 = sld [smem:[#allocation22_spill]] }
 0x1f1   : > { %s2236_s1 = sld [smem:[#allocation21_spill]]  ;;  %s2237_s24 = smov %s1680_s25 }
 0x1f2   : > { %s2239_s27 = smov %s1692_s28  ;;  %32 = sbr.rel (!%p30_p9) target bundleno = 17 (0x11), region = 159 }
 0x1f5   : > { %s2238_s25 = smov %s2234_s14 }
 0x1f7   : > { %s2240_s28 = smov %s2236_s1 }
 0x1f9   :  { %1088 = vsyncpa [#allocation3], 1 }
 0x1fa   :  { %1090 = vsyncpa [#allocation3 + $0x1], 1 }
 0x1fb   :  { %1091 = vsyncpa [#allocation6], 1 }
 0x1fc   :  { %1093 = vsyncpa [#allocation6 + $0x1], 1 }
 0x1fd   :  { %1094 = vsyncpa [#allocation9], 1 }
 0x1fe   :  { %1096 = vsyncpa [#allocation9 + $0x1], 1 }
 0x1ff   :  { %1097 = vsyncpa [#allocation4], 1 }
 0x200   :  { %1099 = vsyncpa [#allocation4 + $0x1], 1 }
 0x201   :  { %1100 = vsyncpa [#allocation12], 1 }
 0x202   :  { %1102 = vsyncpa [#allocation12 + $0x1], 1 }

</bundles_post_ra>
